<compile_context>
chip_gen: v5e
topology: v5e:2x2
jax: 0.10.0
libtpu: 0.0.40
codegen_flags: <defaults>
</compile_context>

<pallas_src>
import functools

import jax
import jax.numpy as jnp
import numpy as np
from jax import lax
from jax.experimental import pallas as pl
from jax.experimental.pallas import tpu as pltpu


def _sas_block(x, is_tl, w, out_dtype):
    """Select-and-scatter for one (rows, L) slice; rolls act along axis=1 (lanes)."""
    l = x.shape[-1]

    # Gather the 2x2 window members onto the window's top-left flat index
    # k = i*w + j (i, j even):  roll(x, l - s)[k] == x[(k + s) % l].
    # Wrapped lanes are never window top-lefts, so they are masked out below.
    r = pltpu.roll(x, l - 1, axis=1)         # x[k+1]      top-right
    d = pltpu.roll(x, l - w, axis=1)         # x[k+w]      bottom-left
    rd = pltpu.roll(x, l - w - 1, axis=1)    # x[k+w+1]    bottom-right

    # 3-compare tournament; ties resolve to the earliest (row-major) element,
    # matching max_pool2d backward / argmax for finite values.
    top = jnp.maximum(x, r) >= jnp.maximum(d, rd)
    x_ge_r = x >= r
    d_ge_rd = d >= rd

    g_a = (top & x_ge_r & is_tl).astype(out_dtype)
    g_r = (top & ~x_ge_r & is_tl).astype(out_dtype)
    g_d = (~top & d_ge_rd & is_tl).astype(out_dtype)
    g_rd = (~top & ~d_ge_rd & is_tl).astype(out_dtype)

    # Scatter each one-hot back to its own position inside the window.  The
    # four parity classes are disjoint, and because the masks are applied
    # BEFORE the roll (max top-left index is L-W-2) nothing wraps, so a plain
    # sum reassembles the full output slice.
    return (g_a
            + pltpu.roll(g_r, 1, axis=1)
            + pltpu.roll(g_d, w, axis=1)
            + pltpu.roll(g_rd, w + 1, axis=1))


def select_and_scatter_kernel(x_ref, o_ref, *, w, sub=8):
    # x_ref / o_ref: (TB, L) block in VMEM, L = H*W flattened row-major.
    tb, l = x_ref.shape

    # Process the block in `sub`-row chunks so temporaries stay in vregs.
    chunk = sub if (tb > sub and tb % sub == 0) else tb
    n_chunks = tb // chunk

    # Window top-left parity mask, hoisted out of the chunk loop.
    col = lax.broadcasted_iota(jnp.int32, (chunk, l), 1)
    if w & (w - 1) == 0:                       # power-of-two W: bit tests
        is_tl = ((col & 1) == 0) & ((col & w) == 0)
    else:
        is_tl = ((col % 2) == 0) & (((col // w) % 2) == 0)

    if n_chunks == 1:
        o_ref[...] = _sas_block(x_ref[...], is_tl, w, o_ref.dtype)
    else:
        def body(i, carry):
            r0 = pl.multiple_of(i * chunk, chunk)
            o_ref[pl.ds(r0, chunk), :] = _sas_block(
                x_ref[pl.ds(r0, chunk), :], is_tl, w, o_ref.dtype)
            return carry

        lax.fori_loop(0, n_chunks, body, 0, unroll=min(n_chunks, 4))


def select_and_scatter(x_nchw, *, target_block_bytes=2 << 20):
    """Gradient of max_pool2d(x, kernel=2, stride=2).sum() w.r.t. x (NCHW)."""
    N, C, H, W = x_nchw.shape
    assert H % 2 == 0 and W % 2 == 0, "2x2 / stride-2 pooling needs even H, W"
    B, L = N * C, H * W
    # TODO(synk): if L = H*W is not a multiple of 128 the lane-dense stores
    # become masked vst.msk; pad W (not the flat L axis) for production shapes.

    # Lane-dense layout: (B, H*W); the whole flattened image maps onto lanes.
    xb = x_nchw.reshape(B, L)
    row_bytes = L * xb.dtype.itemsize
    SUB = 8

    if B <= SUB:
        tb = B                                   # full-extent block is allowed
    else:
        # ~target_block_bytes per block (double-buffered in+out ~= 4x that).
        cand = max(SUB, (target_block_bytes // row_bytes) // SUB * SUB)
        # Guarantee >= 2 grid steps so v7x's two TensorCores both get work and
        # the pipeline has something to overlap.
        cand = min(cand, max(SUB, (B // 2) // SUB * SUB))
        if B % SUB == 0:
            # Largest multiple of 8 that divides B exactly: no pad, no slice,
            # no partial edge block.
            tb = SUB
            d = cand
            while d >= SUB:
                if B % d == 0:
                    tb = d
                    break
                d -= SUB
        else:
            tb = cand                            # Pallas masks the edge block

    grid = pl.cdiv(B, tb)
    vmem_limit = int(min(64 << 20, max(16 << 20, 8 * tb * row_bytes)))

    out = pl.pallas_call(
        functools.partial(select_and_scatter_kernel, w=W, sub=SUB),
        out_shape=jax.ShapeDtypeStruct((B, L), xb.dtype),
        grid=(grid,),
        in_specs=[pl.BlockSpec((tb, L), lambda b: (b, 0))],
        out_specs=pl.BlockSpec((tb, L), lambda b: (b, 0)),
        compiler_params=pltpu.CompilerParams(
            dimension_semantics=("parallel",),   # v7x: 2 TCs split the batch
            vmem_limit_bytes=vmem_limit),
    )(xb)
    return out.reshape(N, C, H, W)


def reference_grad(x):
    """Pure-JAX reference: max_pool2d(2,2) backward with ones upstream grad."""
    N, C, H, W = x.shape
    xw = (x.reshape(N, C, H // 2, 2, W // 2, 2)
           .transpose(0, 1, 2, 4, 3, 5)
           .reshape(N, C, H // 2, W // 2, 4))
    idx = jnp.argmax(xw, axis=-1)                # first-max tie-break
    g = jax.nn.one_hot(idx, 4, dtype=x.dtype)
    g = (g.reshape(N, C, H // 2, W // 2, 2, 2)
          .transpose(0, 1, 2, 4, 3, 5)
          .reshape(N, C, H, W))
    return g


if __name__ == "__main__":
    key = jax.random.PRNGKey(0)
    x = jax.random.normal(key, (2, 4, 16, 16), dtype=jnp.float32)  # NCHW

    out = select_and_scatter(x)
    out = jax.block_until_ready(out)

    ref = reference_grad(x)
    np.testing.assert_allclose(np.asarray(out), np.asarray(ref), atol=0, rtol=0)

    print("KERNEL_OK")
</pallas_src>

<mosaic_0001>
module attributes {stable_mosaic.version = 11 : i64} {
  func.func @select_and_scatter_kernel(%arg0: i32, %arg1: memref<8x256xf32, #tpu.memory_space<vmem>>, %arg2: memref<8x256xf32, #tpu.memory_space<vmem>>) attributes {dimension_semantics = [#tpu.dimension_semantics<parallel>], iteration_bounds = array<i64: 1>, scalar_prefetch = 0 : i64, scratch_operands = 0 : i64, tpu.core_type = #tpu.core_type<tc>, window_params = [{transform_indices = @transform_0, window_bounds = array<i64: 8, 256>}, {transform_indices = @transform_1, window_bounds = array<i64: 8, 256>}]} {
    %0 = tpu.iota {dimensions = array<i32: 1>} : vector<8x256xi32>
    %c1_i32 = arith.constant 1 : i32
    %1 = vector.broadcast %c1_i32 : i32 to vector<8x256xi32>
    %2 = arith.andi %0, %1 : vector<8x256xi32>
    %c0_i32 = arith.constant 0 : i32
    %3 = vector.broadcast %c0_i32 : i32 to vector<8x256xi32>
    %4 = arith.cmpi eq, %2, %3 : vector<8x256xi32>
    %c16_i32 = arith.constant 16 : i32
    %5 = vector.broadcast %c16_i32 : i32 to vector<8x256xi32>
    %6 = arith.andi %0, %5 : vector<8x256xi32>
    %c0_i32_0 = arith.constant 0 : i32
    %7 = vector.broadcast %c0_i32_0 : i32 to vector<8x256xi32>
    %8 = arith.cmpi eq, %6, %7 : vector<8x256xi32>
    %9 = arith.andi %4, %8 : vector<8x256xi1>
    %c0 = arith.constant 0 : index
    %c0_1 = arith.constant 0 : index
    %10 = vector.load %arg1[%c0, %c0_1] : memref<8x256xf32, #tpu.memory_space<vmem>>, vector<8x256xf32>
    %c255_i32 = arith.constant 255 : i32
    %11 = tpu.dynamic_rotate %10 by %c255_i32 dim 1 : vector<8x256xf32>, i32 -> vector<8x256xf32>
    %c240_i32 = arith.constant 240 : i32
    %12 = tpu.dynamic_rotate %10 by %c240_i32 dim 1 : vector<8x256xf32>, i32 -> vector<8x256xf32>
    %c239_i32 = arith.constant 239 : i32
    %13 = tpu.dynamic_rotate %10 by %c239_i32 dim 1 : vector<8x256xf32>, i32 -> vector<8x256xf32>
    %14 = arith.maximumf %10, %11 : vector<8x256xf32>
    %15 = arith.maximumf %12, %13 : vector<8x256xf32>
    %16 = arith.cmpf oge, %14, %15 : vector<8x256xf32>
    %17 = arith.cmpf oge, %10, %11 : vector<8x256xf32>
    %18 = arith.cmpf oge, %12, %13 : vector<8x256xf32>
    %19 = arith.andi %16, %17 : vector<8x256xi1>
    %20 = arith.andi %19, %9 : vector<8x256xi1>
    %21 = arith.extui %20 : vector<8x256xi1> to vector<8x256xi32>
    %22 = arith.sitofp %21 : vector<8x256xi32> to vector<8x256xf32>
    %cst = arith.constant dense<true> : vector<8x256xi1>
    %23 = arith.xori %17, %cst : vector<8x256xi1>
    %24 = arith.andi %16, %23 : vector<8x256xi1>
    %25 = arith.andi %24, %9 : vector<8x256xi1>
    %26 = arith.extui %25 : vector<8x256xi1> to vector<8x256xi32>
    %27 = arith.sitofp %26 : vector<8x256xi32> to vector<8x256xf32>
    %cst_2 = arith.constant dense<true> : vector<8x256xi1>
    %28 = arith.xori %16, %cst_2 : vector<8x256xi1>
    %29 = arith.andi %28, %18 : vector<8x256xi1>
    %30 = arith.andi %29, %9 : vector<8x256xi1>
    %31 = arith.extui %30 : vector<8x256xi1> to vector<8x256xi32>
    %32 = arith.sitofp %31 : vector<8x256xi32> to vector<8x256xf32>
    %cst_3 = arith.constant dense<true> : vector<8x256xi1>
    %33 = arith.xori %16, %cst_3 : vector<8x256xi1>
    %cst_4 = arith.constant dense<true> : vector<8x256xi1>
    %34 = arith.xori %18, %cst_4 : vector<8x256xi1>
    %35 = arith.andi %33, %34 : vector<8x256xi1>
    %36 = arith.andi %35, %9 : vector<8x256xi1>
    %37 = arith.extui %36 : vector<8x256xi1> to vector<8x256xi32>
    %38 = arith.sitofp %37 : vector<8x256xi32> to vector<8x256xf32>
    %c1_i32_5 = arith.constant 1 : i32
    %39 = tpu.dynamic_rotate %27 by %c1_i32_5 dim 1 : vector<8x256xf32>, i32 -> vector<8x256xf32>
    %40 = arith.addf %22, %39 : vector<8x256xf32>
    %c16_i32_6 = arith.constant 16 : i32
    %41 = tpu.dynamic_rotate %32 by %c16_i32_6 dim 1 : vector<8x256xf32>, i32 -> vector<8x256xf32>
    %42 = arith.addf %40, %41 : vector<8x256xf32>
    %c17_i32 = arith.constant 17 : i32
    %43 = tpu.dynamic_rotate %38 by %c17_i32 dim 1 : vector<8x256xf32>, i32 -> vector<8x256xf32>
    %44 = arith.addf %42, %43 : vector<8x256xf32>
    %c0_7 = arith.constant 0 : index
    %c0_8 = arith.constant 0 : index
    %45 = vector.load %arg2[%c0_7, %c0_8] : memref<8x256xf32, #tpu.memory_space<vmem>>, vector<8x256xf32>
    tpu.vector_store %arg2[%c0_7, %c0_8], %44 {strides = array<i32>} : memref<8x256xf32, #tpu.memory_space<vmem>>, vector<8x256xf32>,
    return
  }
  func.func @transform_0(%arg0: i32) -> (i32, i32) {
    %c0_i32 = arith.constant 0 : i32
    %c0_i32_0 = arith.constant 0 : i32
    return %arg0, %c0_i32 : i32, i32
  }
  func.func @transform_1(%arg0: i32) -> (i32, i32) {
    %c0_i32 = arith.constant 0 : i32
    %c0_i32_0 = arith.constant 0 : i32
    return %arg0, %c0_i32 : i32, i32
  }
}

</mosaic_0001>

<bundles_post_ra>
// kernel: tpu_custom_call.1
= control target key start
LH: loop header
LB: loop body
LE: loop exit
PB: predicated region body
PF: predicated region fallthrough
CT: control target
= control target key end

     0   :  { %6 = vsyncpa [#allocation3], 0  ;;  %s353_s0 = inlined_call_operand.hbm [shape: f32[8,256], index: 0, kind: input, shape index: {}]   ;;  %s354_s1 = inlined_call_operand.hbm [shape: f32[8,256], index: 1, kind: output, shape index: {}]  }
   0x1   :  { %7 = vsyncpa [#allocation4], 0  ;;  %s13_s8 = sshll.u32 %s353_s0, 4  ;;  %s238_s9 = smov [#allocation2]   ;;  %s14_s8 = int_to_ptr.hbm [resolvable:$true] %s13_s8 }
   0x2   :  { %s15_s10 = sshll.u32 %s238_s9, 4  ;;  %s16_s10 = int_to_ptr.vmem [resolvable:$true] %s15_s10 }
   0x3   :  { %18 = dma.hbm_to_vmem [thread:$0]  %s14_s8, 256, %s16_s10, [#allocation3]  }
   0x4   :  { %234 = dma.done.wait [#allocation3], 256  }
   0x5   :  { %235 = vsyncadd [#allocation3], 4294967040  ;;  %v36_v0 = vld [vmem:[#allocation2] sm:$0xff]  ;;  %s239_s11 = smov 112   ;;  %s240_s12 = smov 127   ;;  %v37_v1 = vld [vmem:[#allocation2 + $0x8] sm:$0xff]  ;;  %v23_v2 = vlaneseq }
   0x6   :  { %45 = vrot.lane.b32.xlu1 %v36_v0, %s239_s11  ;;  %38 = vrot.lane.b32.xlu0 %v36_v0, %s240_s12  ;;  %s241_s13 = smov 111   ;;  %vm242_vm13 = vmmov 1   ;;  %v371_v32 = vmov 0  ;;  %v243_v33 = vmov 0.0   ;;  %s244_s0 = smov 1  }
   0x7   :  { %52 = vrot.lane.b32.xlu2 %v36_v0, %s241_s13  ;;  %v261_v4 = vand.u32 127, %v23_v2  ;;  %s245_s14 = smov 17   ;;  %s246_s15 = smov 16  }
   0x8   :  { %s247_s16 = smov [#allocation5]   ;;  %s143_s20 = sshll.u32 %s354_s1, 4  ;;  %s144_s20 = int_to_ptr.hbm [resolvable:$true] %s143_s20 }
   0x9   :  { %v25_v5 = vadd.s32 128, %v261_v4  ;;  %v26_v8 = vand.u32 1, %v261_v4  ;;  %v30_v10 = vand.u32 16, %v261_v4  ;;  %vm56_vm0 = vcmp.lt.s32.totalorder %v261_v4, 111  ;;  %s141_s17 = sshll.u32 %s247_s16, 4  ;;  %s142_s17 = int_to_ptr.vmem [resolvable:$true] %s141_s17 }
   0xa   :  { %vm49_vm1 = vcmp.lt.s32.totalorder %v261_v4, 112  ;;  %vm42_vm2 = vcmp.lt.s32.totalorder %v261_v4, 127 }
   0xb   :  { %v27_v9 = vand.u32 1, %v25_v5  ;;  %v31_v11 = vand.u32 16, %v25_v5  ;;  %vm28_vm3 = vcmp.eq.s32.totalorder %v26_v8, 0  ;;  %vm32_vm5 = vcmp.eq.s32.totalorder %v30_v10, 0 }
   0xc   :  { %vm273_vm7 = vmand %vm28_vm3, %vm32_vm5 }
   0xd   :  { %vm269_vm4 = vcmp.eq.s32.totalorder %v27_v9, 0  ;;  %vm33_vm6 = vcmp.eq.s32.totalorder %v31_v11, 0 }
   0xe   :  { %47 = vrot.lane.b32.xlu1 %v37_v1, %s239_s11  ;;  %40 = vrot.lane.b32.xlu0 %v37_v1, %s240_s12  ;;  %vm279_vm9 = vmand %vm269_vm4, %vm33_vm6 }
   0xf   :  { %54 = vrot.lane.b32.xlu2 %v37_v1, %s241_s13 }
  0x61   :  { %v53_v3 = vpop.permute.xlu2 %52 }
  0x69   :  { %v55_v12 = vpop.permute.xlu2 %54 }
  0x6a   :  { %v57_v14 = vsel %vm56_vm0, %v53_v3, %v55_v12  ;;  %v58_v15 = vsel %vm56_vm0, %v55_v12, %v53_v3 }
  0x78   :  { %v46_v6 = vpop.permute.xlu1 %45  ;;  %v39_v7 = vpop.permute.xlu0 %38 }
  0x80   :  { %v48_v16 = vpop.permute.xlu1 %47  ;;  %v41_v17 = vpop.permute.xlu0 %40 }
  0x81   :  { %v50_v18 = vsel %vm49_vm1, %v46_v6, %v48_v16  ;;  %v51_v19 = vsel %vm49_vm1, %v48_v16, %v46_v6  ;;  %v43_v20 = vsel %vm42_vm2, %v39_v7, %v41_v17  ;;  %v44_v21 = vsel %vm42_vm2, %v41_v17, %v39_v7 }
  0x82   :  { %v61_v22 = vmax.f32 %v50_v18, %v57_v14  ;;  %v62_v23 = vmax.f32 %v51_v19, %v58_v15  ;;  %v59_v25 = vmax.f32 %v36_v0, %v43_v20  ;;  %v60_v26 = vmax.f32 %v37_v1, %v44_v21 }
  0x83   :  { %vm65_vm8 = vcmp.ge.f32.partialorder %v36_v0, %v43_v20  ;;  %vm355_vm10 = vcmp.ge.f32.partialorder %v50_v18, %v57_v14  ;;  %vm356_vm15 = vcmp.ge.f32.partialorder %v51_v19, %v58_v15  ;;  %vm66_vm0 = vcmp.ge.f32.partialorder %v37_v1, %v44_v21 }
  0x84   :  { %vm283_vm11 = vcmp.ge.f32.partialorder %v59_v25, %v61_v22  ;;  %vm287_vm12 = vcmp.ge.f32.partialorder %v60_v26, %v62_v23  ;;  %vm292_vm14 = vmxor %vm65_vm8, %vm242_vm13 }
  0x85   :  { %vm69_vm1 = vmand %vm283_vm11, %vm65_vm8 }
  0x86   :  { %vm70_vm2 = vmand %vm287_vm12, %vm66_vm0 }
  0x87   :  { %vm302_vm3 = vmxor %vm355_vm10, %vm242_vm13 }
  0x88   :  { %vm71_vm4 = vmand %vm69_vm1, %vm273_vm7 }
  0x89   :  { %vm310_vm5 = vmxor %vm356_vm15, %vm242_vm13  ;;  %v153_v34 = vsel %vm71_vm4, 1.0, %v243_v33 }
  0x8a   :  { %v372_v32 = vsel %vm310_vm5, 4294967295, %v371_v32  ;;  %vm72_vm6 = vmand %vm70_vm2, %vm279_vm9 }
  0x8b   :  { %v154_v35 = vsel %vm72_vm6, 1.0, %v243_v33  ;;  %vm78_vm8 = vmxor %vm66_vm0, %vm242_vm13 }
  0x8c   :  { %vm79_vm10 = vmand %vm283_vm11, %vm292_vm14 }
  0x8d   :  { %vm80_vm1 = vmand %vm287_vm12, %vm78_vm8 }
  0x8e   :  { %vm81_vm15 = vmand %vm79_vm10, %vm273_vm7  ;;  %vm373_vm10 = vnez %v372_v32 }
  0x8f   :  { %vm82_vm5 = vmand %vm80_vm1, %vm279_vm9  ;;  %v155_v36 = vsel %vm81_vm15, 1.0, %v243_v33  ;;  %vm111_vm1 = vcmp.lt.s32.totalorder %v261_v4, 1 }
  0x90   :  { %vm87_vm2 = vmxor %vm283_vm11, %vm242_vm13  ;;  %v156_v37 = vsel %vm82_vm5, 1.0, %v243_v33  ;;  %vm374_vm5 = vcmp.ge.f32.partialorder %v50_v18, %v57_v14 }
  0x91   :  { %vm88_vm0 = vmxor %vm287_vm12, %vm242_vm13  ;;  %v171_v38 = vpack.i.bf16 %v156_v37, %v155_v36  ;;  %vm375_vm12 = vcmp.ge.f32.partialorder %v51_v19, %v58_v15 }
  0x92   :  { %vm99_vm14 = vmand %vm87_vm2, %vm302_vm3 }
  0x93   :  { %172 = vrot.lane.b32.xlu0 %v171_v38, %s244_s0  ;;  %vm100_vm4 = vmand %vm88_vm0, %vm373_vm10 }
  0x94   :  { %vm101_vm15 = vmand %vm99_vm14, %vm273_vm7 }
  0x95   :  { %vm102_vm11 = vmand %vm100_vm4, %vm279_vm9  ;;  %v159_v39 = vsel %vm101_vm15, 1.0, %v243_v33 }
  0x96   :  { %v160_v40 = vsel %vm102_vm11, 1.0, %v243_v33  ;;  %vm89_vm6 = vmand %vm87_vm2, %vm374_vm5 }
  0x97   :  { %v181_v41 = vpack.i.bf16 %v160_v40, %v159_v39  ;;  %vm90_vm13 = vmand %vm88_vm0, %vm375_vm12 }
  0x98   :  { %vm91_vm3 = vmand %vm89_vm6, %vm273_vm7  ;;  %vm120_vm7 = vcmp.lt.s32.totalorder %v261_v4, 16 }
  0x99   :  { %182 = vrot.lane.b32.xlu2 %v181_v41, %s245_s14  ;;  %vm92_vm8 = vmand %vm90_vm13, %vm279_vm9  ;;  %v157_v42 = vsel %vm91_vm3, 1.0, %v243_v33  ;;  %vm129_vm9 = vcmp.lt.s32.totalorder %v261_v4, 17 }
  0x9a   :  { %v158_v43 = vsel %vm92_vm8, 1.0, %v243_v33 }
  0x9b   :  { %v176_v44 = vpack.i.bf16 %v158_v43, %v157_v42 }
  0x9d   :  { %177 = vrot.lane.b32.xlu1 %v176_v44, %s246_s15 }
  0xf3   :  { %v183_v50 = vpop.permute.xlu2 %182 }
  0xf4   :  { %v185_v54 = vunpack.i.h.bf16 %v183_v50  ;;  %v184_v55 = vunpack.i.l.bf16 %v183_v50 }
  0xf6   :  { %v130_v62 = vsel %vm129_vm9, %v184_v55, %v185_v54  ;;  %v131_v63 = vsel %vm129_vm9, %v185_v54, %v184_v55 }
 0x105   :  { %v173_v45 = vpop.permute.xlu0 %172 }
 0x106   :  { %v175_v46 = vunpack.i.h.bf16 %v173_v45  ;;  %v174_v47 = vunpack.i.l.bf16 %v173_v45 }
 0x108   :  { %v112_v48 = vsel %vm111_vm1, %v174_v47, %v175_v46  ;;  %v113_v49 = vsel %vm111_vm1, %v175_v46, %v174_v47 }
 0x109   :  { %v114_v51 = vadd.f32 %v153_v34, %v113_v49  ;;  %v115_v52 = vadd.f32 %v154_v35, %v112_v48 }
 0x10f   :  { %v178_v53 = vpop.permute.xlu1 %177 }
 0x110   :  { %v180_v56 = vunpack.i.h.bf16 %v178_v53  ;;  %v179_v57 = vunpack.i.l.bf16 %v178_v53 }
 0x112   :  { %v121_v58 = vsel %vm120_vm7, %v179_v57, %v180_v56  ;;  %v122_v59 = vsel %vm120_vm7, %v180_v56, %v179_v57 }
 0x113   :  { %v123_v60 = vadd.f32 %v122_v59, %v114_v51  ;;  %v124_v61 = vadd.f32 %v121_v58, %v115_v52 }
 0x115   :  { %v132_v0 = vadd.f32 %v131_v63, %v123_v60  ;;  %v133_v1 = vadd.f32 %v130_v62, %v124_v61 }
 0x117   :  { %134 = vst [vmem:[#allocation5] sm:$0xff] %v132_v0 }
 0x118   :  { %135 = vst [vmem:[#allocation5 + $0x8] sm:$0xff] %v133_v1 }
 0x119   :  { %146 = dma.vmem_to_hbm [thread:$0]  %s142_s17, 256, %s144_s20, [#allocation4]  }
 0x11a   :  { %236 = dma.done.wait [#allocation4], 256  }
 0x11b   :  { %237 = vsyncadd [#allocation4], 4294967040 }
 0x11c   :  { %151 = vsyncpa [#allocation3], 1 }
 0x11d   :  { %152 = vsyncpa [#allocation4], 1 }

</bundles_post_ra>
